<compile_context>
chip_gen: v6e
topology: v6e:2x2x1
jax: 0.10.0
libtpu: 0.0.40
codegen_flags: <defaults>
</compile_context>

<pallas_src>
import functools
import math

import jax
import jax.numpy as jnp
import numpy as np
from jax import lax
from jax.experimental import pallas as pl
from jax.experimental.pallas import tpu as pltpu

_NEG_INF = -1e30      # finite "-inf": no inf-inf NaNs with fully-masked tiles
_STAT_LANES = 128     # lane-dense softmax statistics (unmasked stores)


def _round_up(x: int, m: int) -> int:
    return (x + m - 1) // m * m


# ---------------------------------------------------------------------------
# Kernel A: fused QKV projection, emitting q/k/v already in (B, H, S, hd).
# ---------------------------------------------------------------------------
def _qkv_proj_kernel(x_ref, w_ref, b_ref, q_ref, k_ref, v_ref, *,
                     num_heads, head_dim, embed_dim):
    x = x_ref[...]                        # (TS, E)   bf16
    w = w_ref[...]                        # (E, 3E)   bf16, Q columns pre-scaled
    y = jnp.dot(x, w, preferred_element_type=jnp.float32) + b_ref[...]
    y = y.astype(q_ref.dtype)             # (TS, 3E)
    # Head-split stores: static lane slices (VPU/XLU work, hidden under the
    # full-width (TS,E)x(E,3E) MXU GEMM).  This replaces the host-side
    # reshape/transpose that previously cost 2 extra HBM passes.
    for j, o_ref in enumerate((q_ref, k_ref, v_ref)):
        base = j * embed_dim
        for h in range(num_heads):
            lo = base + h * head_dim
            o_ref[h] = y[:, lo:lo + head_dim]


# ---------------------------------------------------------------------------
# Kernel B: flash attention (online softmax, head-chunked) + fused out-proj.
# ---------------------------------------------------------------------------
def _flash_attn_kernel(q_ref, k_ref, v_ref, wo_ref, bo_ref, o_ref,
                       m_scr, l_scr, acc_scr, *,
                       num_heads, head_dim, embed_dim, head_chunk,
                       kv_tile, seq_len, masked):
    ki = pl.program_id(2)

    @pl.when(ki == 0)
    def _init():
        m_scr[...] = jnp.full(m_scr.shape, _NEG_INF, m_scr.dtype)
        l_scr[...] = jnp.zeros(l_scr.shape, l_scr.dtype)
        acc_scr[...] = jnp.zeros(acc_scr.shape, acc_scr.dtype)

    # Head-chunked online softmax: bounds the live (chunk, TQ, TK) score /
    # probability temporaries (VMEM / vreg pressure on v7x); MXU work is
    # unchanged and k/v blocks are reused across chunks from VMEM.
    for h0 in range(0, num_heads, head_chunk):
        h1 = min(h0 + head_chunk, num_heads)
        q = q_ref[h0:h1]                  # (c, TQ, hd) bf16 (Q pre-scaled)
        k = k_ref[h0:h1]                  # (c, TK, hd) bf16
        v = v_ref[h0:h1]                  # (c, TK, hd) bf16

        s = jnp.einsum("hqd,hkd->hqk", q, k,
                       preferred_element_type=jnp.float32)    # (c, TQ, TK) f32
        if masked:  # only traced when S was padded
            key_idx = ki * kv_tile + lax.broadcasted_iota(jnp.int32, s.shape, 2)
            s = jnp.where(key_idx < seq_len, s, _NEG_INF)

        m_prev = m_scr[h0:h1]                                  # (c, TQ, 128)
        m_new = jnp.maximum(m_prev, jnp.max(s, axis=-1, keepdims=True))
        alpha = jnp.exp(m_prev - m_new)                        # (c, TQ, 128)
        p = jnp.exp(s - m_new[:, :, :1])                       # (c, TQ, TK)
        l_scr[h0:h1] = alpha * l_scr[h0:h1] + jnp.sum(p, axis=-1, keepdims=True)
        acc_scr[h0:h1] = alpha[:, :, :1] * acc_scr[h0:h1] + jnp.einsum(
            "hqk,hkd->hqd", p.astype(v.dtype), v,
            preferred_element_type=jnp.float32)
        m_scr[h0:h1] = m_new

    @pl.when(ki == pl.num_programs(2) - 1)
    def _finalize():
        l_all = l_scr[...]
        inv_l = pl.reciprocal(l_all[:, :, :1], approx=True)    # (H, TQ, 1), EUP
        ctx = acc_scr[...] * inv_l                             # (H, TQ, hd) f32
        # Lane-concat the heads (XLU) -> ONE K=E GEMM on the MXU (replaces the
        # per-head K=hd matmul loop from the previous version).
        ctx_cat = jnp.concatenate([ctx[h] for h in range(num_heads)], axis=-1)
        out = jnp.dot(ctx_cat.astype(wo_ref.dtype), wo_ref[...],
                      preferred_element_type=jnp.float32) + bo_ref[...]
        o_ref[...] = out.astype(o_ref.dtype)                   # lane-dense (TQ, E)


# ---------------------------------------------------------------------------
# Wrapper
# ---------------------------------------------------------------------------
def attention_forward(x, in_proj_weight, in_proj_bias, out_proj_weight,
                      out_proj_bias, *, num_heads,
                      seq_tile=256,          # v6e: ~512; v7x: 128-256; v5e: modest
                      head_chunk=4,
                      compute_dtype=jnp.bfloat16,
                      vmem_limit_bytes=64 * 1024 * 1024):
    B, S, E = x.shape
    assert E % num_heads == 0
    hd = E // num_heads
    scale = 1.0 / math.sqrt(hd)

    # --- sequence tiling + padding (no whole-S fallback tile) ---------------
    tile = max(8, min(_round_up(seq_tile, 8), _round_up(S, 8)))
    s_pad = _round_up(S, tile)
    masked = s_pad != S

    # --- host-side parameter prep (one-time layout plumbing) ----------------
    col_scale = jnp.concatenate(
        [jnp.full((E,), scale, jnp.float32), jnp.ones((2 * E,), jnp.float32)])
    w_qkv_t = (in_proj_weight.astype(jnp.float32).T * col_scale[None, :]
               ).astype(compute_dtype)                             # (E, 3E)
    b_qkv = (in_proj_bias.astype(jnp.float32) * col_scale).reshape(1, 3 * E)
    w_o_t = out_proj_weight.astype(jnp.float32).T.astype(compute_dtype)  # (E, E)
    b_o = out_proj_bias.astype(jnp.float32).reshape(1, E)

    x_c = x.astype(compute_dtype)
    if masked:
        x_c = jnp.pad(x_c, ((0, 0), (0, s_pad - S), (0, 0)))

    # ---- Kernel A: QKV projection -> q/k/v in (B, H, S_pad, hd) ------------
    # TODO(synk): for E >~ 2048 on v7x, N-tile Wqkv along its 3E columns
    # (extra grid axis), single-buffer the resident weight blocks
    # (pipeline_mode=pl.Buffered(1)) and/or un-fuse the output projection to
    # stay inside the 64 MiB VMEM budget.
    kernel_a = functools.partial(_qkv_proj_kernel, num_heads=num_heads,
                                 head_dim=hd, embed_dim=E)
    qkv_spec = pl.BlockSpec((None, num_heads, tile, hd),
                            lambda b, si: (b, 0, si, 0))
    q, k, v = pl.pallas_call(
        kernel_a,
        out_shape=tuple(
            jax.ShapeDtypeStruct((B, num_heads, s_pad, hd), compute_dtype)
            for _ in range(3)),
        grid_spec=pltpu.PrefetchScalarGridSpec(
            num_scalar_prefetch=0,
            grid=(B, s_pad // tile),
            in_specs=[
                pl.BlockSpec((None, tile, E), lambda b, si: (b, si, 0)),   # x
                pl.BlockSpec((E, 3 * E), lambda b, si: (0, 0)),            # Wqkv^T
                pl.BlockSpec((1, 3 * E), lambda b, si: (0, 0)),            # bqkv
            ],
            out_specs=(qkv_spec, qkv_spec, qkv_spec),
        ),
        compiler_params=pltpu.CompilerParams(
            dimension_semantics=("parallel", "parallel"),
            vmem_limit_bytes=vmem_limit_bytes),
    )(x_c, w_qkv_t, b_qkv)

    # ---- Kernel B: flash attention + fused output projection ---------------
    kernel_b = functools.partial(
        _flash_attn_kernel, num_heads=num_heads, head_dim=hd, embed_dim=E,
        head_chunk=max(1, min(head_chunk, num_heads)),
        kv_tile=tile, seq_len=S, masked=masked)
    out = pl.pallas_call(
        kernel_b,
        out_shape=jax.ShapeDtypeStruct((B, s_pad, E), x.dtype),
        grid_spec=pltpu.PrefetchScalarGridSpec(
            num_scalar_prefetch=0,
            grid=(B, s_pad // tile, s_pad // tile),
            in_specs=[
                pl.BlockSpec((None, num_heads, tile, hd),
                             lambda b, qi, ki: (b, 0, qi, 0)),             # q
                pl.BlockSpec((None, num_heads, tile, hd),
                             lambda b, qi, ki: (b, 0, ki, 0)),             # k
                pl.BlockSpec((None, num_heads, tile, hd),
                             lambda b, qi, ki: (b, 0, ki, 0)),             # v
                pl.BlockSpec((E, E), lambda b, qi, ki: (0, 0)),            # Wo^T
                pl.BlockSpec((1, E), lambda b, qi, ki: (0, 0)),            # bo
            ],
            out_specs=pl.BlockSpec((None, tile, E), lambda b, qi, ki: (b, qi, 0)),
            scratch_shapes=[
                pltpu.VMEM((num_heads, tile, _STAT_LANES), jnp.float32),  # max
                pltpu.VMEM((num_heads, tile, _STAT_LANES), jnp.float32),  # sum
                pltpu.VMEM((num_heads, tile, hd), jnp.float32),           # acc
            ],
        ),
        compiler_params=pltpu.CompilerParams(
            dimension_semantics=("parallel", "parallel", "arbitrary"),
            vmem_limit_bytes=vmem_limit_bytes),
    )(q, k, v, w_o_t, b_o)

    if masked:
        out = out[:, :S, :]
    # TODO(synk): no user-supplied attention/key-padding mask support (the
    # module never passes one); only the internal pad-tail mask is handled.
    return out


# ---------------------------------------------------------------------------
# Pure-JAX reference (mirrors nn.MultiheadAttention forward, f32)
# ---------------------------------------------------------------------------
def _reference(x, wqkv, bqkv, wo, bo, num_heads):
    B, S, E = x.shape
    hd = E // num_heads
    qkv = jnp.einsum("bse,fe->bsf", x, wqkv) + bqkv
    q, k, v = jnp.split(qkv, 3, axis=-1)

    def heads(t):
        return t.reshape(B, S, num_heads, hd).transpose(0, 2, 1, 3)

    q, k, v = heads(q), heads(k), heads(v)
    s = jnp.einsum("bhqd,bhkd->bhqk", q, k) / math.sqrt(hd)
    p = jax.nn.softmax(s, axis=-1)
    ctx = jnp.einsum("bhqk,bhkd->bhqd", p, v)
    ctx = ctx.transpose(0, 2, 1, 3).reshape(B, S, E)
    return jnp.einsum("bse,fe->bsf", ctx, wo) + bo


if __name__ == "__main__":
    B, S, E, H = 2, 8, 32, 4

    key = jax.random.PRNGKey(0)
    kx, k1, k2, k3, k4 = jax.random.split(key, 5)

    x = jax.random.normal(kx, (B, S, E), dtype=jnp.float32)

    # Deterministic synthetic parameters (shapes follow nn.MultiheadAttention).
    in_proj_weight = 0.05 * jax.random.normal(k1, (3 * E, E), dtype=jnp.float32)
    in_proj_bias = 0.01 * jax.random.normal(k2, (3 * E,), dtype=jnp.float32)
    out_proj_weight = 0.05 * jax.random.normal(k3, (E, E), dtype=jnp.float32)
    out_proj_bias = 0.01 * jax.random.normal(k4, (E,), dtype=jnp.float32)

    out = attention_forward(x, in_proj_weight, in_proj_bias,
                            out_proj_weight, out_proj_bias, num_heads=H)
    out = jax.block_until_ready(out)

    ref = _reference(x, in_proj_weight, in_proj_bias,
                     out_proj_weight, out_proj_bias, H)
    # bf16 MXU inputs (f32 accumulation / f32 softmax stats) -> bf16-level tol.
    np.testing.assert_allclose(np.asarray(out), np.asarray(ref),
                               rtol=5e-2, atol=1e-2)

    print("KERNEL_OK")
</pallas_src>

<mosaic_0001>
module attributes {stable_mosaic.version = 11 : i64} {
  func.func @_qkv_proj_kernel(%arg0: i32, %arg1: i32, %arg2: memref<1x8x32xbf16, #tpu.memory_space<vmem>>, %arg3: memref<32x96xbf16, #tpu.memory_space<vmem>>, %arg4: memref<1x96xf32, #tpu.memory_space<vmem>>, %arg5: memref<1x4x8x8xbf16, #tpu.memory_space<vmem>>, %arg6: memref<1x4x8x8xbf16, #tpu.memory_space<vmem>>, %arg7: memref<1x4x8x8xbf16, #tpu.memory_space<vmem>>) attributes {dimension_semantics = [#tpu.dimension_semantics<parallel>, #tpu.dimension_semantics<parallel>], iteration_bounds = array<i64: 2, 1>, scalar_prefetch = 0 : i64, scratch_operands = 0 : i64, tpu.core_type = #tpu.core_type<tc>, window_params = [{transform_indices = @transform_0, window_bounds = array<i64: 1, 8, 32>}, {pipeline_mode = #tpu.pipeline_mode<synchronous>, transform_indices = @transform_1, window_bounds = array<i64: 32, 96>}, {pipeline_mode = #tpu.pipeline_mode<synchronous>, transform_indices = @transform_2, window_bounds = array<i64: 1, 96>}, {transform_indices = @transform_3, window_bounds = array<i64: 1, 4, 8, 8>}, {transform_indices = @transform_4, window_bounds = array<i64: 1, 4, 8, 8>}, {transform_indices = @transform_5, window_bounds = array<i64: 1, 4, 8, 8>}]} {
    %c0 = arith.constant 0 : index
    %c0_0 = arith.constant 0 : index
    %c0_1 = arith.constant 0 : index
    %0 = vector.load %arg2[%c0, %c0_0, %c0_1] : memref<1x8x32xbf16, #tpu.memory_space<vmem>>, vector<1x8x32xbf16>
    %1 = vector.shape_cast %0 : vector<1x8x32xbf16> to vector<8x32xbf16>
    %c0_2 = arith.constant 0 : index
    %c0_3 = arith.constant 0 : index
    %2 = vector.load %arg3[%c0_2, %c0_3] : memref<32x96xbf16, #tpu.memory_space<vmem>>, vector<32x96xbf16>
    %cst = arith.constant dense<0.000000e+00> : vector<8x96xf32>
    %3 = tpu.matmul %1, %2, %cst {dimension_numbers = #tpu.dot_dimension_numbers<[1], [0], [0], [1], [0, 0, 1, 1], [], []>} : vector<8x32xbf16>, vector<32x96xbf16>, vector<8x96xf32> -> vector<8x96xf32>
    %c0_4 = arith.constant 0 : index
    %c0_5 = arith.constant 0 : index
    %4 = vector.load %arg4[%c0_4, %c0_5] : memref<1x96xf32, #tpu.memory_space<vmem>>, vector<1x96xf32>
    %5 = vector.broadcast %4 : vector<1x96xf32> to vector<8x96xf32>
    %6 = arith.addf %3, %5 : vector<8x96xf32>
    %7 = arith.truncf %6 : vector<8x96xf32> to vector<8x96xbf16>
    %8 = vector.extract_strided_slice %7 {offsets = [0, 0], sizes = [8, 8], strides = [1, 1]} : vector<8x96xbf16> to vector<8x8xbf16>
    %c0_6 = arith.constant 0 : index
    %c0_7 = arith.constant 0 : index
    %c0_8 = arith.constant 0 : index
    %c0_9 = arith.constant 0 : index
    %9 = vector.load %arg5[%c0_6, %c0_7, %c0_8, %c0_9] : memref<1x4x8x8xbf16, #tpu.memory_space<vmem>>, vector<1x1x8x8xbf16>
    %10 = vector.shape_cast %9 : vector<1x1x8x8xbf16> to vector<8x8xbf16>
    %11 = vector.shape_cast %8 : vector<8x8xbf16> to vector<1x1x8x8xbf16>
    tpu.vector_store %arg5[%c0_6, %c0_7, %c0_8, %c0_9], %11 {strides = array<i32>} : memref<1x4x8x8xbf16, #tpu.memory_space<vmem>>, vector<1x1x8x8xbf16>,
    %12 = vector.extract_strided_slice %7 {offsets = [0, 8], sizes = [8, 8], strides = [1, 1]} : vector<8x96xbf16> to vector<8x8xbf16>
    %c0_10 = arith.constant 0 : index
    %c1 = arith.constant 1 : index
    %c0_11 = arith.constant 0 : index
    %c0_12 = arith.constant 0 : index
    %13 = vector.load %arg5[%c0_10, %c1, %c0_11, %c0_12] : memref<1x4x8x8xbf16, #tpu.memory_space<vmem>>, vector<1x1x8x8xbf16>
    %14 = vector.shape_cast %13 : vector<1x1x8x8xbf16> to vector<8x8xbf16>
    %15 = vector.shape_cast %12 : vector<8x8xbf16> to vector<1x1x8x8xbf16>
    tpu.vector_store %arg5[%c0_10, %c1, %c0_11, %c0_12], %15 {strides = array<i32>} : memref<1x4x8x8xbf16, #tpu.memory_space<vmem>>, vector<1x1x8x8xbf16>,
    %16 = vector.extract_strided_slice %7 {offsets = [0, 16], sizes = [8, 8], strides = [1, 1]} : vector<8x96xbf16> to vector<8x8xbf16>
    %c0_13 = arith.constant 0 : index
    %c2 = arith.constant 2 : index
    %c0_14 = arith.constant 0 : index
    %c0_15 = arith.constant 0 : index
    %17 = vector.load %arg5[%c0_13, %c2, %c0_14, %c0_15] : memref<1x4x8x8xbf16, #tpu.memory_space<vmem>>, vector<1x1x8x8xbf16>
    %18 = vector.shape_cast %17 : vector<1x1x8x8xbf16> to vector<8x8xbf16>
    %19 = vector.shape_cast %16 : vector<8x8xbf16> to vector<1x1x8x8xbf16>
    tpu.vector_store %arg5[%c0_13, %c2, %c0_14, %c0_15], %19 {strides = array<i32>} : memref<1x4x8x8xbf16, #tpu.memory_space<vmem>>, vector<1x1x8x8xbf16>,
    %20 = vector.extract_strided_slice %7 {offsets = [0, 24], sizes = [8, 8], strides = [1, 1]} : vector<8x96xbf16> to vector<8x8xbf16>
    %c0_16 = arith.constant 0 : index
    %c3 = arith.constant 3 : index
    %c0_17 = arith.constant 0 : index
    %c0_18 = arith.constant 0 : index
    %21 = vector.load %arg5[%c0_16, %c3, %c0_17, %c0_18] : memref<1x4x8x8xbf16, #tpu.memory_space<vmem>>, vector<1x1x8x8xbf16>
    %22 = vector.shape_cast %21 : vector<1x1x8x8xbf16> to vector<8x8xbf16>
    %23 = vector.shape_cast %20 : vector<8x8xbf16> to vector<1x1x8x8xbf16>
    tpu.vector_store %arg5[%c0_16, %c3, %c0_17, %c0_18], %23 {strides = array<i32>} : memref<1x4x8x8xbf16, #tpu.memory_space<vmem>>, vector<1x1x8x8xbf16>,
    %24 = vector.extract_strided_slice %7 {offsets = [0, 32], sizes = [8, 8], strides = [1, 1]} : vector<8x96xbf16> to vector<8x8xbf16>
    %c0_19 = arith.constant 0 : index
    %c0_20 = arith.constant 0 : index
    %c0_21 = arith.constant 0 : index
    %c0_22 = arith.constant 0 : index
    %25 = vector.load %arg6[%c0_19, %c0_20, %c0_21, %c0_22] : memref<1x4x8x8xbf16, #tpu.memory_space<vmem>>, vector<1x1x8x8xbf16>
    %26 = vector.shape_cast %25 : vector<1x1x8x8xbf16> to vector<8x8xbf16>
    %27 = vector.shape_cast %24 : vector<8x8xbf16> to vector<1x1x8x8xbf16>
    tpu.vector_store %arg6[%c0_19, %c0_20, %c0_21, %c0_22], %27 {strides = array<i32>} : memref<1x4x8x8xbf16, #tpu.memory_space<vmem>>, vector<1x1x8x8xbf16>,
    %28 = vector.extract_strided_slice %7 {offsets = [0, 40], sizes = [8, 8], strides = [1, 1]} : vector<8x96xbf16> to vector<8x8xbf16>
    %c0_23 = arith.constant 0 : index
    %c1_24 = arith.constant 1 : index
    %c0_25 = arith.constant 0 : index
    %c0_26 = arith.constant 0 : index
    %29 = vector.load %arg6[%c0_23, %c1_24, %c0_25, %c0_26] : memref<1x4x8x8xbf16, #tpu.memory_space<vmem>>, vector<1x1x8x8xbf16>
    %30 = vector.shape_cast %29 : vector<1x1x8x8xbf16> to vector<8x8xbf16>
    %31 = vector.shape_cast %28 : vector<8x8xbf16> to vector<1x1x8x8xbf16>
    tpu.vector_store %arg6[%c0_23, %c1_24, %c0_25, %c0_26], %31 {strides = array<i32>} : memref<1x4x8x8xbf16, #tpu.memory_space<vmem>>, vector<1x1x8x8xbf16>,
    %32 = vector.extract_strided_slice %7 {offsets = [0, 48], sizes = [8, 8], strides = [1, 1]} : vector<8x96xbf16> to vector<8x8xbf16>
    %c0_27 = arith.constant 0 : index
    %c2_28 = arith.constant 2 : index
    %c0_29 = arith.constant 0 : index
    %c0_30 = arith.constant 0 : index
    %33 = vector.load %arg6[%c0_27, %c2_28, %c0_29, %c0_30] : memref<1x4x8x8xbf16, #tpu.memory_space<vmem>>, vector<1x1x8x8xbf16>
    %34 = vector.shape_cast %33 : vector<1x1x8x8xbf16> to vector<8x8xbf16>
    %35 = vector.shape_cast %32 : vector<8x8xbf16> to vector<1x1x8x8xbf16>
    tpu.vector_store %arg6[%c0_27, %c2_28, %c0_29, %c0_30], %35 {strides = array<i32>} : memref<1x4x8x8xbf16, #tpu.memory_space<vmem>>, vector<1x1x8x8xbf16>,
    %36 = vector.extract_strided_slice %7 {offsets = [0, 56], sizes = [8, 8], strides = [1, 1]} : vector<8x96xbf16> to vector<8x8xbf16>
    %c0_31 = arith.constant 0 : index
    %c3_32 = arith.constant 3 : index
    %c0_33 = arith.constant 0 : index
    %c0_34 = arith.constant 0 : index
    %37 = vector.load %arg6[%c0_31, %c3_32, %c0_33, %c0_34] : memref<1x4x8x8xbf16, #tpu.memory_space<vmem>>, vector<1x1x8x8xbf16>
    %38 = vector.shape_cast %37 : vector<1x1x8x8xbf16> to vector<8x8xbf16>
    %39 = vector.shape_cast %36 : vector<8x8xbf16> to vector<1x1x8x8xbf16>
    tpu.vector_store %arg6[%c0_31, %c3_32, %c0_33, %c0_34], %39 {strides = array<i32>} : memref<1x4x8x8xbf16, #tpu.memory_space<vmem>>, vector<1x1x8x8xbf16>,
    %40 = vector.extract_strided_slice %7 {offsets = [0, 64], sizes = [8, 8], strides = [1, 1]} : vector<8x96xbf16> to vector<8x8xbf16>
    %c0_35 = arith.constant 0 : index
    %c0_36 = arith.constant 0 : index
    %c0_37 = arith.constant 0 : index
    %c0_38 = arith.constant 0 : index
    %41 = vector.load %arg7[%c0_35, %c0_36, %c0_37, %c0_38] : memref<1x4x8x8xbf16, #tpu.memory_space<vmem>>, vector<1x1x8x8xbf16>
    %42 = vector.shape_cast %41 : vector<1x1x8x8xbf16> to vector<8x8xbf16>
    %43 = vector.shape_cast %40 : vector<8x8xbf16> to vector<1x1x8x8xbf16>
    tpu.vector_store %arg7[%c0_35, %c0_36, %c0_37, %c0_38], %43 {strides = array<i32>} : memref<1x4x8x8xbf16, #tpu.memory_space<vmem>>, vector<1x1x8x8xbf16>,
    %44 = vector.extract_strided_slice %7 {offsets = [0, 72], sizes = [8, 8], strides = [1, 1]} : vector<8x96xbf16> to vector<8x8xbf16>
    %c0_39 = arith.constant 0 : index
    %c1_40 = arith.constant 1 : index
    %c0_41 = arith.constant 0 : index
    %c0_42 = arith.constant 0 : index
    %45 = vector.load %arg7[%c0_39, %c1_40, %c0_41, %c0_42] : memref<1x4x8x8xbf16, #tpu.memory_space<vmem>>, vector<1x1x8x8xbf16>
    %46 = vector.shape_cast %45 : vector<1x1x8x8xbf16> to vector<8x8xbf16>
    %47 = vector.shape_cast %44 : vector<8x8xbf16> to vector<1x1x8x8xbf16>
    tpu.vector_store %arg7[%c0_39, %c1_40, %c0_41, %c0_42], %47 {strides = array<i32>} : memref<1x4x8x8xbf16, #tpu.memory_space<vmem>>, vector<1x1x8x8xbf16>,
    %48 = vector.extract_strided_slice %7 {offsets = [0, 80], sizes = [8, 8], strides = [1, 1]} : vector<8x96xbf16> to vector<8x8xbf16>
    %c0_43 = arith.constant 0 : index
    %c2_44 = arith.constant 2 : index
    %c0_45 = arith.constant 0 : index
    %c0_46 = arith.constant 0 : index
    %49 = vector.load %arg7[%c0_43, %c2_44, %c0_45, %c0_46] : memref<1x4x8x8xbf16, #tpu.memory_space<vmem>>, vector<1x1x8x8xbf16>
    %50 = vector.shape_cast %49 : vector<1x1x8x8xbf16> to vector<8x8xbf16>
    %51 = vector.shape_cast %48 : vector<8x8xbf16> to vector<1x1x8x8xbf16>
    tpu.vector_store %arg7[%c0_43, %c2_44, %c0_45, %c0_46], %51 {strides = array<i32>} : memref<1x4x8x8xbf16, #tpu.memory_space<vmem>>, vector<1x1x8x8xbf16>,
    %52 = vector.extract_strided_slice %7 {offsets = [0, 88], sizes = [8, 8], strides = [1, 1]} : vector<8x96xbf16> to vector<8x8xbf16>
    %c0_47 = arith.constant 0 : index
    %c3_48 = arith.constant 3 : index
    %c0_49 = arith.constant 0 : index
    %c0_50 = arith.constant 0 : index
    %53 = vector.load %arg7[%c0_47, %c3_48, %c0_49, %c0_50] : memref<1x4x8x8xbf16, #tpu.memory_space<vmem>>, vector<1x1x8x8xbf16>
    %54 = vector.shape_cast %53 : vector<1x1x8x8xbf16> to vector<8x8xbf16>
    %55 = vector.shape_cast %52 : vector<8x8xbf16> to vector<1x1x8x8xbf16>
    tpu.vector_store %arg7[%c0_47, %c3_48, %c0_49, %c0_50], %55 {strides = array<i32>} : memref<1x4x8x8xbf16, #tpu.memory_space<vmem>>, vector<1x1x8x8xbf16>,
    return
  }
  func.func @transform_0(%arg0: i32, %arg1: i32) -> (i32, i32, i32) {
    %c0_i32 = arith.constant 0 : i32
    %c0_i32_0 = arith.constant 0 : i32
    return %arg0, %arg1, %c0_i32 : i32, i32, i32
  }
  func.func @transform_1(%arg0: i32, %arg1: i32) -> (i32, i32) {
    %c0_i32 = arith.constant 0 : i32
    %c0_i32_0 = arith.constant 0 : i32
    %c0_i32_1 = arith.constant 0 : i32
    return %c0_i32, %c0_i32_0 : i32, i32
  }
  func.func @transform_2(%arg0: i32, %arg1: i32) -> (i32, i32) {
    %c0_i32 = arith.constant 0 : i32
    %c0_i32_0 = arith.constant 0 : i32
    %c0_i32_1 = arith.constant 0 : i32
    return %c0_i32, %c0_i32_0 : i32, i32
  }
  func.func @transform_3(%arg0: i32, %arg1: i32) -> (i32, i32, i32, i32) {
    %c0_i32 = arith.constant 0 : i32
    %c0_i32_0 = arith.constant 0 : i32
    %c0_i32_1 = arith.constant 0 : i32
    return %arg0, %c0_i32, %arg1, %c0_i32_0 : i32, i32, i32, i32
  }
  func.func @transform_4(%arg0: i32, %arg1: i32) -> (i32, i32, i32, i32) {
    %c0_i32 = arith.constant 0 : i32
    %c0_i32_0 = arith.constant 0 : i32
    %c0_i32_1 = arith.constant 0 : i32
    return %arg0, %c0_i32, %arg1, %c0_i32_0 : i32, i32, i32, i32
  }
  func.func @transform_5(%arg0: i32, %arg1: i32) -> (i32, i32, i32, i32) {
    %c0_i32 = arith.constant 0 : i32
    %c0_i32_0 = arith.constant 0 : i32
    %c0_i32_1 = arith.constant 0 : i32
    return %arg0, %c0_i32, %arg1, %c0_i32_0 : i32, i32, i32, i32
  }
}

</mosaic_0001>

<bundles_post_ra>
// kernel: tpu_custom_call.1
= control target key start
LH: loop header
LB: loop body
LE: loop exit
PB: predicated region body
PF: predicated region fallthrough
CT: control target
= control target key end

     0   :  { %s1329_s0 = inlined_call_operand.hbm [shape: bf16[2,8,32], index: 0, kind: input, shape index: {}]   ;;  %s1330_s1 = inlined_call_operand.hbm [shape: bf16[32,96], index: 1, kind: input, shape index: {}]   ;;  %s1331_s2 = inlined_call_operand.vmem [shape: f32[1,96], index: 2, kind: input, shape index: {}]   ;;  %s1332_s3 = inlined_call_operand.hbm [shape: bf16[2,4,8,8], index: 3, kind: output, shape index: {0}]   ;;  %s1333_s4 = inlined_call_operand.hbm [shape: bf16[2,4,8,8], index: 4, kind: output, shape index: {1}]   ;;  %s1334_s5 = inlined_call_operand.hbm [shape: bf16[2,4,8,8], index: 5, kind: output, shape index: {2}]  }
   0x1   :  { %1338 = sst [smem:[#allocation16_spill]] %s1330_s1 }
   0x2   :  { %11 = vsyncpa [#allocation3], 0 }
   0x3   :  { %13 = vsyncpa [#allocation3 + $0x1], 0 }
   0x4   :  { %14 = vsyncpa [#allocation6], 0 }
   0x5   :  { %15 = vsyncpa [#allocation4], 0 }
   0x6   :  { %17 = vsyncpa [#allocation4 + $0x1], 0 }
   0x7   :  { %18 = vsyncpa [#allocation9], 0 }
   0x8   :  { %20 = vsyncpa [#allocation9 + $0x1], 0  ;;  %s1041_s18 = smov 0   ;;  %s1043_s19 = smov 0  }
   0x9   :  { %s1045_s20 = smov 0   ;;  %s1047_s21 = smov 0  }
   0xa   :  { %s1049_s22 = smov 0   ;;  %s1051_s23 = smov 0  }
   0xb LB: > { %s1072_s24 = sadd.s32 4294967295, %s988_s23   ;;  %s1335_s25 = sadd.s32 4294967294, %s988_s23   ;;  %s988_s23 = sphi %s1051_s23, %s26_s23   ;;  %s984_s22 = sphi %s1049_s22, %s1359_s22   ;;  %s980_s21 = sphi %s1047_s21, %s1358_s21   ;;  %s976_s20 = sphi %s1045_s20, %s1357_s20   ;;  %s972_s19 = sphi %s1043_s19, %s1356_s19   ;;  %s968_s18 = sphi %s1041_s18, %s1355_s18  }
   0xc   : > { %p60_p0 = scmp.ne.s32.totalorder %s972_s19, %s968_s18  ;;  %p1337_p1 = scmp.eq.s32.totalorder %s1072_s24, 0 }
   0xd   : > { %p134_p3 = scmp.eq.s32.totalorder %s1335_s25, 1  ;;  %p642_p5 = scmp.ge.s32.totalorder %s988_s23, 1 }
   0xe   : > { %p1083_p4 = por %p1337_p1, %p60_p0  ;;  %p197_p7 = scmp.lt.s32.totalorder %s988_s23, 3 }
   0xf   : > { %p1088_p6 = por %p134_p3, %p60_p0  ;;  %s990_s29 = smov [#allocation5]  }
  0x10   : > { %p1093_p8 = pnand %p642_p5, %p197_p7  ;;  %s209_s30 = sshll.u32 %s990_s29, 4  ;;  %s210_s30 = int_to_ptr.vmem [resolvable:$true] %s209_s30 }
  0x11   : > { %s1340_s27 = scalar_select %p1088_p6, 1, 0 }
  0x12   : > { %p705_p9 = pneg %p1093_p8  ;;  %s38_s7 = sadd.s32 1, %s984_s22 }
  0x13   : > { %s805_s8 = scalar_lea.vmem %s210_s30, 256  ;;  %p813_p5 = scmp.lt.s32.totalorder %s210_s30, %s210_s30 }
  0x14   : > { %p1102_p11 = pnand %p705_p9, %p1337_p1  ;;  %p806_p13 = scmp.ne.s32.totalorder %s210_s30, %s805_s8 }
  0x15   : > { %p814_p7 = scmp.lt.s32.totalorder %s805_s8, %s805_s8 }
  0x16   : > { %p796_p12 = pneg %p1102_p11 }
  0x17   : > { %p815_p2 = por %p814_p7, %p813_p5 }
  0x18   : > { %p808_p0 = pnand %p806_p13, %p796_p12 }
  0x1a   : > { %p809_p3 = pneg %p808_p0 }
  0x1c   : > { %p816_p6 = pnand %p815_p2, %p809_p3 }
  0x1e   : > { %819 = shalt.err (!%p816_p6)
}
  0x1f   : > { %s991_s9 = smov 64   ;;  %s992_s10 = smov 4  }
  0x20   : > { %s1343_s1 = sld [smem:[#allocation16_spill]]  ;;  %p40_p2 = scmp.ge.s32.totalorder %s38_s7, 2 }
  0x21   : > { %s47_s13 = sadd.s32 1, %s976_s20  ;;  %p54_p6 = scmp.ne.s32.totalorder %s976_s20, %s972_s19 }
  0x22   : > { %p55_p9 = scmp.eq.s32.totalorder %s988_s23, 0  ;;  %s1361_s7 = smov (%p40_p2, %s38_s7), 0 }
  0x23   : > { %1344 = sst [smem:[#allocation15_spill]] %s1361_s7  ;;  %p1346_p13 = scmp.eq.s32.totalorder %s1072_s24, 1 }
  0x24   : > { %p1120_p12 = por %p55_p9, %p54_p6  ;;  %s42_s16 = ssub.s32 %s984_s22, %s1361_s7 }
  0x25   : > { %p1126_p0 = por %p1346_p13, %p54_p6  ;;  %p724_p3 = scmp.lt.s32.totalorder %s988_s23, 2 }
  0x26   : > { %708 = dma.hbm_to_vmem [thread:$0]  (!%p1102_p11), %s1343_s1, 256, %s210_s30, [#allocation6], %s991_s9, %s991_s9, %s992_s10  }
  0x27   : > { %p45_p11 = scmp.eq.s32.totalorder %s42_s16, 0  ;;  %s226_s17 = sand.u32 1, %s976_s20  }
  0x28   : > { %s645_s29 = sshll.u32 %s226_s17, 2  ;;  %s646_s6 = sshll.u32 %s984_s22, 6 }
  0x29   : > { %s1135_s30 = scalar_select %p45_p11, %s976_s20, %s47_s13  }
  0x2a   : > { %s236_s10 = scalar_lea.hbm %s1329_s0, %s646_s6  ;;  %s230_s11 = scalar_lea.vmem [#allocation2], %s645_s29 }
  0x2b   : > { %s238_s12 = sshll.u32 %s230_s11, 4  ;;  %p1143_p5 = pnand %p724_p3, %p1120_p12  ;;  %s239_s12 = int_to_ptr.vmem [resolvable:$true] %s238_s12 }
  0x2c   : > { %s227_s1 = scalar_lea.sflag [#allocation3], %s226_s17  ;;  %s833_s16 = scalar_lea.vmem %s239_s12, 64 }
  0x2d   : > { %p822_p7 = pneg %p1143_p5  ;;  %p834_p2 = scmp.ne.s32.totalorder %s239_s12, %s833_s16 }
  0x2e   : > { %s993_s13 = smov [#allocation2]  }
  0x2f   : > { %p836_p6 = pnand %p834_p2, %p822_p7  ;;  %s838_s7 = sshll.u32 %s993_s13, 4  ;;  %s839_s7 = int_to_ptr.vmem [resolvable:$false] %s838_s7 }
  0x30   : > { %s840_s6 = scalar_lea.vmem %s839_s7, 128  ;;  %p841_p13 = scmp.lt.s32.totalorder %s239_s12, %s839_s7 }
  0x31   : > { %p837_p9 = pneg %p836_p6  ;;  %p842_p11 = scmp.lt.s32.totalorder %s840_s6, %s833_s16 }
  0x33   : > { %p843_p10 = por %p842_p11, %p841_p13 }
  0x35   : > { %p844_p1 = pnand %p843_p10, %p837_p9 }
  0x37   : > { %847 = shalt.err (!%p844_p1)
}
  0x38   : > { %712 = dma.hbm_to_vmem [thread:$0]  (!%p1143_p5), %s236_s10, 64, %s239_s12, %s227_s1  }
  0x39   : > { %247 = sbr.rel (%p1093_p8) target bundleno = 450 (0x1c2), region = 32  ;;  %s1154_s14 = sand.u32 (!%p1093_p8), 1, %s972_s19  }
  0x3a   : > { %s648_s17 = sshll.u32 (!%p1093_p8), %s1154_s14, 2  ;;  %s250_s29 = scalar_lea.sflag (!%p1093_p8), [#allocation3], %s1154_s14 }
  0x3b   : > { %s253_s8 = scalar_lea.vmem (!%p1093_p8), [#allocation2], %s648_s17 }
  0x3e   : > { %951 = dma.done.wait (%p1083_p4), %s250_s29, 64  }
  0x3f   : > { %953 = vsyncadd (%p1083_p4), %s250_s29, 4294967232  ;;  %p1349_p1 = scmp.eq.s32.totalorder %s1072_s24, 0 }
  0x41   : > { %955 = dma.done.wait (%p1349_p1), [#allocation6], 256   ;;  %p1350_p10 = pmov %p1349_p1 }
  0x42   : > { %v994_v0 = vmov 0.0   ;;  %vm995_vm0 = vmmov 0   ;;  %v792_v1 = vld [vmem:[#allocation5 + $0x8] sm:$0xff]   ;;  %v793_v2 = vld [vmem:[#allocation5] sm:$0xff]   ;;  %v295_v3 = vld [vmem:[%s253_s8] sm:$0xf] }
  0x43   : > { %957 = vsyncadd (%p1350_p10), [#allocation6], 4294967040  ;;  %685 = vmatprep.subr.bf16.mxu0 %v994_v0  ;;  %689 = vmatprep.mubr.msk.bf16.mxu0 %vm995_vm0, %v994_v0  ;;  %vm319_vm1 = vcmask 261120   ;;  %v653_v4 = vld [vmem:[%s1331_s2] ss:$0 sm:$0xff]  ;;  %s1170_s26 = sshll.u32 %s1154_s14, 4 }
  0x44   : > { %686 = vmatpush3.bf16.msra.mxu0 %v792_v1  ;;  %vm364_vm2 = vcmask 60416   ;;  %s996_s28 = smov 80   ;;  %s997_s7 = smov 96  }
  0x45   : > { %687 = vmatprep.subr.bf16.mxu0 %v994_v0  ;;  %s1173_s9 = scalar_lea.vmem [#allocation7], %s1170_s26  ;;  %s998_s10 = smov 72  }
  0x46   : > { %s999_s11 = smov 88   ;;  %s1000_s12 = smov 112  }
  0x47   : > { %s1001_s16 = smov 120   ;;  %s1002_s13 = smov 64  }
  0x48   : > { %688 = vmatpush3.bf16.msra.mxu0 %v793_v2  ;;  %s1003_s6 = smov 104   ;;  %s1004_s17 = smov 48  }
  0x49   : > { %s1005_s29 = smov 56   ;;  %s1006_s8 = smov 40  }
  0x4a   : > { %s286_s1 = scalar_lea.vmem [#allocation8], %s1170_s26 }
  0x4b   : > { %690 = vmatmul.mubr.msk.bf16.vlgmr.msra.gmra.mxu0 %vm319_vm1, %v295_v3  ;;  %s464_s25 = sshll.u32 %s286_s1, 4  ;;  %s1185_s25 = int_to_ptr.vmem [resolvable:$true] %s464_s25 }
 0x10b   : > { %v357_v5 = vpop.f32.mrf.mxu0 }
 0x10c   : > { %v358_v6 = vadd.f32 %v653_v4, %v357_v5 }
 0x10d   : > { %v691_v7 = vpop.f32.mrf.mxu0 }
 0x10e   : > { %v363_v8 = vpack.c.bf16 %v358_v6, %v358_v6 }
 0x10f   : > { %v360_v9 = vpop.f32.mrf.mxu0 }
 0x110   : > { %393 = vrot.lane.b32.xlu1 %v363_v8, %s996_s28  ;;  %384 = vrot.lane.b32.xlu0 %v363_v8, %s997_s7  ;;  %365 = vst.msk [vmem:[%s1173_s9] sm:$0xf] %vm364_vm2, %v363_v8  ;;  %s427_s28 = sand.u32 1, %s1072_s24   ;;  %s1181_s7 = sshll.u32 %s980_s21, 8 }
 0x111   : > { %v692_v10 = vpop.f32.mrf.mxu0  ;;  %s1195_s21 = scalar_lea.sflag [#allocation9], %s427_s28  ;;  %s848_s24 = scalar_lea.vmem %s1185_s25, 256 }
 0x112   : > { %p849_p4 = scmp.ne.s32.totalorder %s1185_s25, %s848_s24 }
 0x114   : > { %398 = vrot.lane.b32.xlu1 %v363_v8, %s998_s10  ;;  %388 = vrot.lane.b32.xlu0 %v363_v8, %s999_s11  ;;  %p850_p8 = pnand %p849_p4, %p1126_p0 }
 0x116   : > { %p851_p12 = pneg %p850_p8 }
 0x118   : > { %374 = vrot.lane.b32.xlu1 %v363_v8, %s1000_s12  ;;  %369 = vrot.lane.b32.xlu0 %v363_v8, %s1001_s16  ;;  %s1191_s12 = scalar_lea.hbm %s1333_s4, %s1181_s7  ;;  %s1007_s16 = smov [#allocation8]  }
 0x11c   : > { %403 = vrot.lane.b32.xlu1 %v363_v8, %s1002_s13  ;;  %379 = vrot.lane.b32.xlu0 %v363_v8, %s1003_s6  ;;  %s852_s6 = sshll.u32 %s1007_s16, 4  ;;  %s853_s6 = int_to_ptr.vmem [resolvable:$false] %s852_s6 }
 0x11d   : > { %p855_p3 = scmp.lt.s32.totalorder %s1185_s25, %s853_s6 }
 0x120   : > { %412 = vrot.lane.b32.xlu1 %v363_v8, %s1004_s17  ;;  %407 = vrot.lane.b32.xlu0 %v363_v8, %s1005_s29  ;;  %s854_s17 = scalar_lea.vmem %s853_s6, 512 }
 0x121   : > { %p856_p5 = scmp.lt.s32.totalorder %s854_s17, %s848_s24 }
 0x123   : > { %p857_p7 = por %p856_p5, %p855_p3 }
 0x124   : > { %417 = vrot.lane.b32.xlu0 %v363_v8, %s1006_s8 }
 0x125   : > { %p858_p2 = pnand %p857_p7, %p851_p12 }
 0x182   : > { %v394_v11 = vpop.permute.xlu1 %393  ;;  %v385_v12 = vpop.permute.xlu0 %384 }
 0x183   : > { %662 = vst.msk [vmem:[%s286_s1 + $0x8] sm:$0xf] %vm364_vm2, %v394_v11  ;;  %387 = vst.msk [vmem:[%s286_s1] sm:$0xf] %vm364_vm2, %v385_v12 }
 0x186   : > { %v399_v13 = vpop.permute.xlu1 %398  ;;  %v389_v14 = vpop.permute.xlu0 %388 }
 0x187   : > { %663 = vst.msk [vmem:[%s286_s1 + $0xc] sm:$0xf] %vm364_vm2, %v399_v13  ;;  %661 = vst.msk [vmem:[%s286_s1 + $0x4] sm:$0xf] %vm364_vm2, %v389_v14 }
 0x188   : > { %861 = shalt.err (!%p858_p2)
}
 0x189   : > { %s862_s29 = scalar_lea.hbm %s1191_s12, 256  ;;  %s866_s28 = scalar_lea.hbm %s1333_s4, 512 }
 0x18a   : > { %p863_p6 = scmp.ne.s32.totalorder %s1191_s12, %s862_s29  ;;  %p867_p11 = scmp.lt.s32.totalorder %s1191_s12, %s1333_s4 }
 0x18b   : > { %p868_p1 = scmp.lt.s32.totalorder %s866_s28, %s862_s29 }
 0x18c   : > { %p864_p9 = pnand %p863_p6, %p1126_p0 }
 0x18d   : > { %p869_p10 = por %p868_p1, %p867_p11 }
 0x18e   : > { %p865_p13 = pneg %p864_p9 }
 0x190   : > { %p870_p4 = pnand %p869_p10, %p865_p13 }
 0x192   : > { %873 = shalt.err (!%p870_p4)
}
 0x193   : > { %s1008_s24 = smov 4   ;;  %s447_s16 = sshll.u32 %s1173_s9, 4  ;;  %v375_v15 = vpop.permute.xlu1 %374  ;;  %v370_v16 = vpop.permute.xlu0 %369  ;;  %s1226_s16 = int_to_ptr.vmem [resolvable:$true] %s447_s16 }
 0x194   : > { %700 = dma.vmem_to_hbm [thread:$0]  (%p1126_p0), %s1185_s25, 256, %s1191_s12, %s1195_s21, %s1002_s13, %s1002_s13, %s1008_s24  }
 0x195   : > { %659 = vst.msk [vmem:[%s1173_s9 + $0x8] sm:$0xf] %vm364_vm2, %v375_v15  ;;  %658 = vst.msk [vmem:[%s1173_s9 + $0x4] sm:$0xf] %vm364_vm2, %v370_v16  ;;  %s1232_s29 = scalar_lea.hbm %s1332_s3, %s1181_s7  ;;  %s1235_s25 = scalar_lea.vmem [#allocation10], %s1170_s26 }
 0x196   : > { %s423_s12 = scalar_lea.sflag [#allocation4], %s1154_s14  ;;  %s874_s8 = scalar_lea.vmem %s1226_s16, 256 }
 0x197   : > { %v404_v17 = vpop.permute.xlu1 %403  ;;  %v380_v18 = vpop.permute.xlu0 %379  ;;  %p875_p8 = scmp.ne.s32.totalorder %s1226_s16, %s874_s8  ;;  %s1009_s1 = smov [#allocation7]  }
 0x198   : > { %406 = vst.msk [vmem:[%s1235_s25] sm:$0xf] %vm364_vm2, %v404_v17  ;;  %660 = vst.msk [vmem:[%s1173_s9 + $0xc] sm:$0xf] %vm364_vm2, %v380_v18  ;;  %s878_s28 = sshll.u32 %s1009_s1, 4  ;;  %s879_s28 = int_to_ptr.vmem [resolvable:$false] %s878_s28 }
 0x199   : > { %p876_p12 = pnand %p875_p8, %p1126_p0  ;;  %s880_s10 = scalar_lea.vmem %s879_s28, 512 }
 0x19a   : > { %p881_p5 = scmp.lt.s32.totalorder %s1226_s16, %s879_s28  ;;  %p882_p7 = scmp.lt.s32.totalorder %s880_s10, %s874_s8 }
 0x19b   : > { %p877_p3 = pneg %p876_p12 }
 0x19c   : > { %p883_p2 = por %p882_p7, %p881_p5 }
 0x19e   : > { %p884_p6 = pnand %p883_p2, %p877_p3 }
 0x1a0   : > { %887 = shalt.err (!%p884_p6)
}
 0x1a1   : > { %s888_s26 = scalar_lea.hbm %s1232_s29, 256  ;;  %s892_s11 = scalar_lea.hbm %s1332_s3, 512 }
 0x1a2   : > { %p889_p9 = scmp.ne.s32.totalorder %s1232_s29, %s888_s26  ;;  %p893_p1 = scmp.lt.s32.totalorder %s1232_s29, %s1332_s3 }
 0x1a3   : > { %p894_p10 = scmp.lt.s32.totalorder %s892_s11, %s888_s26 }
 0x1a4   : > { %p890_p13 = pnand %p889_p9, %p1126_p0 }
 0x1a5   : > { %p895_p4 = por %p894_p10, %p893_p1 }
 0x1a6   : > { %p891_p11 = pneg %p890_p13 }
 0x1a8   : > { %p896_p8 = pnand %p895_p4, %p891_p11 }
 0x1aa   : > { %899 = shalt.err (!%p896_p8)
}
 0x1ab   : > { %699 = dma.vmem_to_hbm [thread:$0]  (%p1126_p0), %s1226_s16, 256, %s1232_s29, %s423_s12, %s1002_s13, %s1002_s13, %s1008_s24   ;;  %v413_v19 = vpop.permute.xlu1 %412  ;;  %v408_v20 = vpop.permute.xlu0 %407 }
 0x1ac   : > { %s481_s8 = sshll.u32 %s1235_s25, 4  ;;  %665 = vst.msk [vmem:[%s1235_s25 + $0x8] sm:$0xf] %vm364_vm2, %v413_v19  ;;  %664 = vst.msk [vmem:[%s1235_s25 + $0x4] sm:$0xf] %vm364_vm2, %v408_v20  ;;  %s1276_s10 = scalar_lea.hbm %s1334_s5, %s1181_s7  ;;  %s1270_s8 = int_to_ptr.vmem [resolvable:$true] %s481_s8 }
 0x1ad   : > { %s900_s16 = scalar_lea.vmem %s1270_s8, 256  ;;  %s1010_s29 = smov [#allocation10]  }
 0x1ae   : > { %p901_p12 = scmp.ne.s32.totalorder %s1270_s8, %s900_s16  ;;  %s904_s12 = sshll.u32 %s1010_s29, 4  ;;  %s905_s12 = int_to_ptr.vmem [resolvable:$false] %s904_s12 }
 0x1af   : > { %v418_v21 = vpop.permute.xlu0 %417  ;;  %s906_s26 = scalar_lea.vmem %s905_s12, 512  ;;  %p907_p7 = scmp.lt.s32.totalorder %s1270_s8, %s905_s12 }
 0x1b0   : > { %666 = vst.msk [vmem:[%s1235_s25 + $0xc] sm:$0xf] %vm364_vm2, %v418_v21  ;;  %p902_p3 = pnand %p901_p12, %p1126_p0  ;;  %p908_p2 = scmp.lt.s32.totalorder %s906_s26, %s900_s16 }
 0x1b2   : > { %p903_p5 = pneg %p902_p3  ;;  %p909_p6 = por %p908_p2, %p907_p7 }
 0x1b4   : > { %p910_p9 = pnand %p909_p6, %p903_p5 }
 0x1b6   : > { %913 = shalt.err (!%p910_p9)
}
 0x1b7   : > { %s914_s7 = scalar_lea.hbm %s1276_s10, 256  ;;  %s918_s9 = scalar_lea.hbm %s1334_s5, 512 }
 0x1b8   : > { %p915_p13 = scmp.ne.s32.totalorder %s1276_s10, %s914_s7  ;;  %p919_p10 = scmp.lt.s32.totalorder %s1276_s10, %s1334_s5 }
 0x1b9   : > { %p920_p4 = scmp.lt.s32.totalorder %s918_s9, %s914_s7 }
 0x1ba   : > { %p916_p11 = pnand %p915_p13, %p1126_p0 }
 0x1bb   : > { %p921_p8 = por %p920_p4, %p919_p10 }
 0x1bc   : > { %p917_p1 = pneg %p916_p11 }
 0x1be   : > { %p922_p12 = pnand %p921_p8, %p917_p1 }
 0x1c0   : > { %925 = shalt.err (!%p922_p12)
}
 0x1c1   : > { %701 = dma.vmem_to_hbm [thread:$0]  (%p1126_p0), %s1270_s8, 256, %s1276_s10, %s1195_s21, %s1002_s13, %s1002_s13, %s1008_s24  }
 0x1c2 PF: > { %s496_s17 = sand.u32 1, %s968_s18   ;;  %p1351_p3 = scmp.ne.s32.totalorder %s1340_s27, 0 }
 0x1c3   : > { %p1352_p5 = scmp.ge.s32.totalorder %s988_s23, 2  ;;  %s497_s1 = scalar_lea.sflag [#allocation4], %s496_s17 }
 0x1c5   : > { %p714_p7 = pnand %p1352_p5, %p1351_p3 }
 0x1c7   : > { %p715_p2 = pneg %p714_p7 }
 0x1c9   : > { %959 = dma.done.wait (%p715_p2), %s497_s1, 256  }
 0x1ca   : > { %961 = vsyncadd (%p715_p2), %s497_s1, 4294967040  ;;  %s1353_s15 = sadd.s32 4294967294, %s988_s23  }
 0x1cb   : > { %s505_s28 = sand.u32 1, %s1353_s15  }
 0x1cc   : > { %s506_s16 = scalar_lea.sflag [#allocation9], %s505_s28 }
 0x1cd   : > { %963 = dma.done.wait (%p715_p2), %s506_s16, 512  }
 0x1ce   : > { %965 = vsyncadd (%p715_p2), %s506_s16, 4294966784  ;;  %s26_s23 = sadd.s32 1, %s988_s23   ;;  %s1354_s27 = sld [smem:[#allocation15_spill]] }
 0x1cf   : > { %p23_p0 = scmp.ge.s32.totalorder %s26_s23, 4   ;;  %s1355_s18 = smov %s972_s19 }
 0x1d0   : > { %s1356_s19 = smov %s976_s20  ;;  %s1357_s20 = smov %s1135_s30 }
 0x1d1   : > { %s1358_s21 = smov %s984_s22  ;;  %25 = sbr.rel (!%p23_p0) target bundleno = 11 (0xb), region = 122 }
 0x1d4   : > { %s1359_s22 = smov %s1354_s27 }
 0x1d6   :  { %520 = vsyncpa [#allocation3], 1 }
 0x1d7   :  { %522 = vsyncpa [#allocation3 + $0x1], 1 }
 0x1d8   :  { %523 = vsyncpa [#allocation6], 1 }
 0x1d9   :  { %524 = vsyncpa [#allocation4], 1 }
 0x1da   :  { %526 = vsyncpa [#allocation4 + $0x1], 1 }
 0x1db   :  { %527 = vsyncpa [#allocation9], 1 }
 0x1dc   :  { %529 = vsyncpa [#allocation9 + $0x1], 1 }

</bundles_post_ra>
